<compile_context>
chip_gen: v7x
topology: tpu7x:2x2x1
jax: 0.10.0
libtpu: 0.0.40
codegen_flags: <defaults>
</compile_context>

<pallas_src>
import functools

import jax
import jax.numpy as jnp
from jax.experimental import pallas as pl
from jax.experimental.pallas import tpu as pltpu


# ----------------------------- Pallas kernel -------------------------------

def _linear_kernel(x_ref, w_ref, b_ref, o_ref):
    """y = x @ W + b for one row-tile of the batch.

    x_ref: [tm, f_in]   (VMEM)
    w_ref: [f_in, f_out] (VMEM, whole weight, same block for every tile)
    b_ref: [1, f_out]    (VMEM)
    o_ref: [tm, f_out]   (VMEM)
    """
    y = jnp.dot(x_ref[...], w_ref[...], preferred_element_type=jnp.float32)
    # Single lane-dense full-block store (bias broadcast fused).
    o_ref[...] = (y + b_ref[...].astype(jnp.float32)).astype(o_ref.dtype)


def linear_forward(x, w, b, *, block_rows=128):
    """Pallas forward of LinearRegressionModel.

    x: [B, f_in] float32
    w: [f_in, f_out] float32   (== PyTorch linear1.weight.T)
    b: [1, f_out] float32      (== PyTorch linear1.bias[None, :])
    returns [B, f_out] float32
    """
    batch, f_in = x.shape
    f_out = w.shape[1]

    # Row tile: whole batch if it is small, otherwise 128-row tiles
    # (multiple of the 8-sublane granule).  Fall back to a single block if the
    # batch does not divide evenly — at toy sizes that is always the case.
    if batch <= block_rows or batch % block_rows != 0:
        tm = batch
    else:
        tm = block_rows
    grid = (batch // tm,)

    return pl.pallas_call(
        _linear_kernel,
        out_shape=jax.ShapeDtypeStruct((batch, f_out), x.dtype),
        grid_spec=pltpu.PrefetchScalarGridSpec(
            num_scalar_prefetch=0,
            grid=grid,
            in_specs=[
                pl.BlockSpec((tm, f_in), lambda i: (i, 0)),    # x row tile
                pl.BlockSpec((f_in, f_out), lambda i: (0, 0)),  # full weight
                pl.BlockSpec((1, f_out), lambda i: (0, 0)),     # bias
            ],
            out_specs=pl.BlockSpec((tm, f_out), lambda i: (i, 0)),
        ),
        compiler_params=pltpu.CompilerParams(
            dimension_semantics=("parallel",),
        ),
    )(x, w, b)


# ------------------------------ param setup --------------------------------

def init_linear_params(key, input_dim, output_dim):
    """Deterministic parameters matching nn.Linear's shapes.

    PyTorch stores weight as [out, in]; we keep the transposed [in, out]
    layout so the kernel's matmul and output store are lane-dense.
    """
    kw, kb = jax.random.split(key)
    bound = 1.0 / jnp.sqrt(jnp.float32(input_dim))
    w = jax.random.uniform(kw, (input_dim, output_dim), jnp.float32,
                           minval=-bound, maxval=bound)
    b = jax.random.uniform(kb, (1, output_dim), jnp.float32,
                           minval=-bound, maxval=bound)
    return {"w": w, "b": b}


# --------------------------------- main -------------------------------------

if __name__ == "__main__":
    BATCH = 8
    INPUT_DIM = 16
    OUTPUT_DIM = 4

    key = jax.random.PRNGKey(0)
    kx, kp = jax.random.split(key)

    x = jax.random.normal(kx, (BATCH, INPUT_DIM), jnp.float32)
    params = init_linear_params(kp, INPUT_DIM, OUTPUT_DIM)

    y = linear_forward(x, params["w"], params["b"])
    y = jax.block_until_ready(y)

    # Pure-JAX reference (identical math to nn.Linear forward).
    y_ref = x @ params["w"] + params["b"]

    assert y.shape == (BATCH, OUTPUT_DIM)
    assert bool(jnp.all(jnp.isfinite(y)))
    assert bool(jnp.allclose(y, y_ref, rtol=1e-5, atol=1e-5))

    print("KERNEL_OK")
</pallas_src>

<mosaic_0001>
module attributes {stable_mosaic.version = 11 : i64} {
  func.func @_linear_kernel(%arg0: i32, %arg1: memref<8x16xf32, #tpu.memory_space<vmem>>, %arg2: memref<16x4xf32, #tpu.memory_space<vmem>>, %arg3: memref<1x4xf32, #tpu.memory_space<vmem>>, %arg4: memref<8x4xf32, #tpu.memory_space<vmem>>) attributes {dimension_semantics = [#tpu.dimension_semantics<parallel>], iteration_bounds = array<i64: 1>, scalar_prefetch = 0 : i64, scratch_operands = 0 : i64, tpu.core_type = #tpu.core_type<tc>, window_params = [{transform_indices = @transform_0, window_bounds = array<i64: 8, 16>}, {pipeline_mode = #tpu.pipeline_mode<synchronous>, transform_indices = @transform_1, window_bounds = array<i64: 16, 4>}, {pipeline_mode = #tpu.pipeline_mode<synchronous>, transform_indices = @transform_2, window_bounds = array<i64: 1, 4>}, {transform_indices = @transform_3, window_bounds = array<i64: 8, 4>}]} {
    %c0 = arith.constant 0 : index
    %c0_0 = arith.constant 0 : index
    %0 = vector.load %arg1[%c0, %c0_0] : memref<8x16xf32, #tpu.memory_space<vmem>>, vector<8x16xf32>
    %c0_1 = arith.constant 0 : index
    %c0_2 = arith.constant 0 : index
    %1 = vector.load %arg2[%c0_1, %c0_2] : memref<16x4xf32, #tpu.memory_space<vmem>>, vector<16x4xf32>
    %cst = arith.constant dense<0.000000e+00> : vector<8x4xf32>
    %2 = tpu.matmul %0, %1, %cst {dimension_numbers = #tpu.dot_dimension_numbers<[1], [0], [0], [1], [0, 0, 1, 1], [], []>} : vector<8x16xf32>, vector<16x4xf32>, vector<8x4xf32> -> vector<8x4xf32>
    %c0_3 = arith.constant 0 : index
    %c0_4 = arith.constant 0 : index
    %3 = vector.load %arg3[%c0_3, %c0_4] : memref<1x4xf32, #tpu.memory_space<vmem>>, vector<1x4xf32>
    %4 = vector.broadcast %3 : vector<1x4xf32> to vector<8x4xf32>
    %5 = arith.addf %2, %4 : vector<8x4xf32>
    %c0_5 = arith.constant 0 : index
    %c0_6 = arith.constant 0 : index
    %6 = vector.load %arg4[%c0_5, %c0_6] : memref<8x4xf32, #tpu.memory_space<vmem>>, vector<8x4xf32>
    tpu.vector_store %arg4[%c0_5, %c0_6], %5 {strides = array<i32>} : memref<8x4xf32, #tpu.memory_space<vmem>>, vector<8x4xf32>,
    return
  }
  func.func @transform_0(%arg0: i32) -> (i32, i32) {
    %c0_i32 = arith.constant 0 : i32
    %c0_i32_0 = arith.constant 0 : i32
    return %arg0, %c0_i32 : i32, i32
  }
  func.func @transform_1(%arg0: i32) -> (i32, i32) {
    %c0_i32 = arith.constant 0 : i32
    %c0_i32_0 = arith.constant 0 : i32
    %c0_i32_1 = arith.constant 0 : i32
    return %c0_i32, %c0_i32_0 : i32, i32
  }
  func.func @transform_2(%arg0: i32) -> (i32, i32) {
    %c0_i32 = arith.constant 0 : i32
    %c0_i32_0 = arith.constant 0 : i32
    %c0_i32_1 = arith.constant 0 : i32
    return %c0_i32, %c0_i32_0 : i32, i32
  }
  func.func @transform_3(%arg0: i32) -> (i32, i32) {
    %c0_i32 = arith.constant 0 : i32
    %c0_i32_0 = arith.constant 0 : i32
    return %arg0, %c0_i32 : i32, i32
  }
}

</mosaic_0001>

<bundles_post_ra>
// kernel: tpu_custom_call.1
= control target key start
LH: loop header
LB: loop body
LE: loop exit
PB: predicated region body
PF: predicated region fallthrough
CT: control target
= control target key end

     0   :  { %v122_v0 = vmov 0.0|0.0   ;;  %vm123_vm0 = vmmov 0   ;;  %v124_v3 = vmov 0.0   ;;  %vm24_vm1 = vcmask 130048   ;;  %s160_s1 = inlined_call_operand.vmem [shape: f32[16,4], index: 1, kind: input, shape index: {}]   ;;  %s161_s0 = inlined_call_operand.vmem [shape: f32[8,16], index: 0, kind: input, shape index: {}]   ;;  %s162_s2 = inlined_call_operand.vmem [shape: f32[1,4], index: 2, kind: input, shape index: {}]   ;;  %s163_s3 = inlined_call_operand.vmem [shape: f32[8,4], index: 3, kind: output, shape index: {}]  }
   0x1   :  { %116 = vmatprep.subr.bf16.mxu0 %v122_v0  ;;  %v15_v1 = vld [vmem:[%s160_s1] sm:$0xff]  ;;  %v16_v2 = vld [vmem:[%s160_s1 + $0x8] sm:$0xff]  ;;  %113 = vmatprep.mubr.msk.f32.mxu0 %vm123_vm0, %v124_v3  ;;  %vm98_vm2 = vcmask 31744  }
   0x2   :  { %v117_v4 = vpack.c.bf16 %v16_v2, %v15_v1  ;;  %v14_v5 = vld [vmem:[%s161_s0] sm:$0xff] }
   0x3   :  { %v104_v6 = vld [vmem:[%s162_s2] ss:$0 sm:$0xff] }
   0x4   :  { %118 = vmatpush3.bf16.msra.mxu0 %v117_v4 }
   0x7   :  { %114 = vmatmul.mubr.msk.f32.vlgmr.msra.gmra.mrb[0].mxu0 %vm24_vm1, %v14_v5 }
  0xda   :  { %v94_v7 = vpop.f32.mrb[0].mxu0 }
  0xdb   :  { %v95_v8 = vadd.f32 %v104_v6, %v94_v7  ;;  %v115_v9 = vpop.f32.mrb[1].mxu0 }
  0xdd   :  { %99 = vst.msk [vmem:[%s163_s3] sm:$0xff] %vm98_vm2, %v95_v8 }

</bundles_post_ra>
